<compile_context>
chip_gen: v6e
topology: v6e:2x2x1
jax: 0.10.0
libtpu: 0.0.40
codegen_flags: <defaults>
</compile_context>

<pallas_src>
import math

import jax
import jax.numpy as jnp
from jax.experimental import pallas as pl
from jax.experimental.pallas import tpu as pltpu


def _pe_add_kernel(x_ref, pe_ref, o_ref):
    # x_ref / o_ref: (tile_s, B, D) VMEM tiles;  pe_ref: (tile_s, 1, D).
    # Single broadcast-add over the batch axis.  The cast is a no-op for f32
    # inputs and happens at (tile_s, 1, D) scale (not (tile_s, B, D)) for bf16.
    o_ref[...] = x_ref[...] + pe_ref[...].astype(x_ref.dtype)


def _build_pe_table(max_len, d_model):
    """(max_len, 1, d_model) float32 sinusoidal table; same math as PyTorch."""
    position = jnp.arange(max_len, dtype=jnp.float32)[:, None]
    div_term = jnp.exp(
        jnp.arange(0, d_model, 2, dtype=jnp.float32)
        * (-math.log(10000.0) / d_model)
    )
    pe = jnp.zeros((max_len, d_model), dtype=jnp.float32)
    pe = pe.at[:, 0::2].set(jnp.sin(position * div_term))
    pe = pe.at[:, 1::2].set(jnp.cos(position * div_term))
    return pe[:, None, :]  # (max_len, 1, d_model)


def _choose_tile_s(S, row_bytes, *, target_tile_bytes=2 << 20, min_steps=8):
    """Largest divisor of S whose x-tile is ~<=2 MiB, preferring >= min_steps
    grid steps (pipelining + v7x dual-TC).  Double-buffered in+pe+out is then
    ~4-5x the tile, far below the v5e/v6e/v7x scoped VMEM defaults."""
    cap = max(1, target_tile_bytes // max(row_bytes, 1))
    if S >= min_steps:
        cap = min(cap, max(1, S // min_steps))
    cap = min(cap, S)
    tile_s = 1
    for t in range(1, cap + 1):
        if S % t == 0:
            tile_s = t
    return tile_s


class PositionalEncoding:
    """JAX/Pallas port of the PyTorch PositionalEncoding module.

    Input x has shape (S, B, d_model) (seq-first), returns x + pe[:S].
    """

    def __init__(self, d_model, max_len=5000):
        self.d_model = d_model
        self.max_len = max_len
        self.pe = _build_pe_table(max_len, d_model)  # (max_len, 1, d_model) f32

    def __call__(self, x, *, tile_s=None):
        S, B, D = x.shape
        assert D == self.d_model, "d_model mismatch"
        assert S <= self.max_len, "sequence longer than max_len"

        itemsize = jnp.dtype(x.dtype).itemsize
        if tile_s is None:
            tile_s = _choose_tile_s(S, B * D * itemsize)
        assert S % tile_s == 0, "tile_s must divide the sequence length"
        grid = (S // tile_s,)

        # Batch / d_model are never tiled -> block last-two dims == array dims.
        x_spec = pl.BlockSpec((tile_s, B, D), lambda i: (i, 0, 0))
        pe_spec = pl.BlockSpec((tile_s, 1, D), lambda i: (i, 0, 0))

        cost = pl.CostEstimate(
            flops=S * B * D,
            transcendentals=0,
            bytes_accessed=2 * S * B * D * itemsize + S * D * 4,
        )

        return pl.pallas_call(
            _pe_add_kernel,
            out_shape=jax.ShapeDtypeStruct((S, B, D), x.dtype),
            grid_spec=pltpu.PrefetchScalarGridSpec(
                num_scalar_prefetch=0,
                grid=grid,
                in_specs=[x_spec, pe_spec],
                out_specs=x_spec,
            ),
            compiler_params=pltpu.CompilerParams(
                dimension_semantics=("parallel",),
            ),
            cost_estimate=cost,
        )(x, self.pe)


def _reference(x):
    """Pure-JAX reference mirroring the PyTorch module's forward."""
    S, B, D = x.shape
    position = jnp.arange(S, dtype=jnp.float32)[:, None]
    div_term = jnp.exp(jnp.arange(0, D, 2, dtype=jnp.float32)
                       * (-jnp.log(10000.0) / D))
    pe = jnp.zeros((S, D), dtype=jnp.float32)
    pe = pe.at[:, 0::2].set(jnp.sin(position * div_term))
    pe = pe.at[:, 1::2].set(jnp.cos(position * div_term))
    return x + pe[:, None, :]


if __name__ == "__main__":
    seq, batch, d_model = 8, 2, 32  # (S, B, D), seq-first like the PyTorch module
    key = jax.random.PRNGKey(0)
    x = jax.random.normal(key, (seq, batch, d_model), dtype=jnp.float32)

    module = PositionalEncoding(d_model, max_len=5000)
    out = jax.block_until_ready(module(x))

    ref = _reference(x)
    assert out.shape == x.shape and out.dtype == x.dtype
    assert jnp.allclose(out, ref, atol=1e-5, rtol=1e-5)

    print("KERNEL_OK")
</pallas_src>

<mosaic_0001>
module attributes {stable_mosaic.version = 11 : i64} {
  func.func @_pe_add_kernel(%arg0: i32, %arg1: memref<1x2x32xf32, #tpu.memory_space<vmem>>, %arg2: memref<1x1x32xf32, #tpu.memory_space<vmem>>, %arg3: memref<1x2x32xf32, #tpu.memory_space<vmem>>) attributes {dimension_semantics = [#tpu.dimension_semantics<parallel>], iteration_bounds = array<i64: 8>, scalar_prefetch = 0 : i64, scratch_operands = 0 : i64, tpu.core_type = #tpu.core_type<tc>, window_params = [{transform_indices = @transform_0, window_bounds = array<i64: 1, 2, 32>}, {transform_indices = @transform_1, window_bounds = array<i64: 1, 1, 32>}, {transform_indices = @transform_2, window_bounds = array<i64: 1, 2, 32>}]} {
    %c0 = arith.constant 0 : index
    %c0_0 = arith.constant 0 : index
    %c0_1 = arith.constant 0 : index
    %0 = vector.load %arg1[%c0, %c0_0, %c0_1] : memref<1x2x32xf32, #tpu.memory_space<vmem>>, vector<1x2x32xf32>
    %c0_2 = arith.constant 0 : index
    %c0_3 = arith.constant 0 : index
    %c0_4 = arith.constant 0 : index
    %1 = vector.load %arg2[%c0_2, %c0_3, %c0_4] : memref<1x1x32xf32, #tpu.memory_space<vmem>>, vector<1x1x32xf32>
    %2 = vector.broadcast %1 : vector<1x1x32xf32> to vector<1x2x32xf32>
    %3 = arith.addf %0, %2 : vector<1x2x32xf32>
    %c0_5 = arith.constant 0 : index
    %c0_6 = arith.constant 0 : index
    %c0_7 = arith.constant 0 : index
    %4 = vector.load %arg3[%c0_5, %c0_6, %c0_7] : memref<1x2x32xf32, #tpu.memory_space<vmem>>, vector<1x2x32xf32>
    tpu.vector_store %arg3[%c0_5, %c0_6, %c0_7], %3 {strides = array<i32>} : memref<1x2x32xf32, #tpu.memory_space<vmem>>, vector<1x2x32xf32>,
    return
  }
  func.func @transform_0(%arg0: i32) -> (i32, i32, i32) {
    %c0_i32 = arith.constant 0 : i32
    %c0_i32_0 = arith.constant 0 : i32
    %c0_i32_1 = arith.constant 0 : i32
    return %arg0, %c0_i32, %c0_i32_0 : i32, i32, i32
  }
  func.func @transform_1(%arg0: i32) -> (i32, i32, i32) {
    %c0_i32 = arith.constant 0 : i32
    %c0_i32_0 = arith.constant 0 : i32
    %c0_i32_1 = arith.constant 0 : i32
    return %arg0, %c0_i32, %c0_i32_0 : i32, i32, i32
  }
  func.func @transform_2(%arg0: i32) -> (i32, i32, i32) {
    %c0_i32 = arith.constant 0 : i32
    %c0_i32_0 = arith.constant 0 : i32
    %c0_i32_1 = arith.constant 0 : i32
    return %arg0, %c0_i32, %c0_i32_0 : i32, i32, i32
  }
}

</mosaic_0001>

<bundles_post_ra>
// kernel: tpu_custom_call.1
= control target key start
LH: loop header
LB: loop body
LE: loop exit
PB: predicated region body
PF: predicated region fallthrough
CT: control target
= control target key end

     0   :  { %7 = vsyncpa [#allocation3], 0  ;;  %s466_s0 = inlined_call_operand.vmem [shape: f32[8,2,32], index: 0, kind: input, shape index: {}]   ;;  %s467_s1 = inlined_call_operand.vmem [shape: f32[5000,1,32], index: 1, kind: input, shape index: {}]   ;;  %s468_s2 = inlined_call_operand.hbm [shape: f32[8,2,32], index: 2, kind: output, shape index: {}]  }
   0x1   :  { %9 = vsyncpa [#allocation3 + $0x1], 0  ;;  %s374_s9 = smov 0   ;;  %s376_s10 = smov 0  }
   0x2   :  { %s378_s11 = smov 0   ;;  %s380_s12 = smov 0  }
   0x3 LB: > { %s395_s13 = sadd.s32 4294967295, %s356_s12   ;;  %s246_s14 = sadd.s32 4294967294, %s356_s12   ;;  %s356_s12 = sphi %s380_s12, %s474_s12   ;;  %s352_s11 = sphi %s378_s11, %s473_s11   ;;  %s348_s10 = sphi %s376_s10, %s472_s10   ;;  %s344_s9 = sphi %s374_s9, %s471_s9  }
   0x4   : > { %s399_s15 = sadd.s32 1, %s356_s12   ;;  %s74_s16 = sadd.s32 1, %s352_s11 }
   0x5   : > { %s71_s17 = ssub.s32 %s356_s12, %s399_s15  ;;  %p84_p0 = scmp.ne.s32.totalorder %s352_s11, %s348_s10 }
   0x6   : > { %p72_p1 = scmp.eq.s32.totalorder %s71_s17, 0  ;;  %p85_p2 = scmp.eq.s32.totalorder %s395_s13, 7 }
   0x7   : > { %p90_p3 = scmp.ne.s32.totalorder %s348_s10, %s344_s9  ;;  %p91_p4 = scmp.eq.s32.totalorder %s246_s14, 7 }
   0x8   : > { %s410_s18 = scalar_select %p72_p1, %s352_s11, %s74_s16  }
   0x9   : > { %p412_p5 = por %p85_p2, %p84_p0  ;;  %p416_p6 = por %p91_p4, %p90_p3 }
   0xa   : > { %p249_p7 = scmp.ge.s32.totalorder %s356_s12, 1  ;;  %p122_p8 = scmp.lt.s32.totalorder %s356_s12, 9 }
   0xc   : > { %p123_p9 = pnand %p249_p7, %p122_p8 }
   0xd   : > { %s143_s21 = sand.u32 (!%p123_p9), 1, %s348_s10   ;;  %p146_p10 = scmp.lt.s32.totalorder (!%p123_p9), %s395_s13, 7 }
   0xe   : > { %126 = sbr.rel (%p123_p9) target bundleno = 43 (0x2b), region = 28  ;;  %s250_s22 = sshll.u32 (!%p123_p9), %s143_s21, 1 }
   0xf   : > { %p150_p11 = scmp.lt.s32.totalorder (!%p123_p9), %s395_s13, 4999  ;;  %s145_s26 = scalar_lea.vmem (!%p123_p9), [#allocation2], %s250_s22 }
  0x10   : > { %s178_s27 = sshll.u32 (!%p123_p9), %s145_s26, 4  ;;  %s254_s6 = sshll.u32 (!%p123_p9), %s395_s13, 5  ;;  %s179_s27 = int_to_ptr.vmem [resolvable:$true] %s178_s27 }
  0x11   : > { %s176_s14 = scalar_lea.hbm (!%p123_p9), %s468_s2, %s254_s6  ;;  %s165_s16 = scalar_lea.sflag (!%p123_p9), [#allocation3], %s143_s21 }
  0x12   : > { %s296_s17 = scalar_lea.vmem (!%p123_p9), %s179_s27, 32  ;;  %s358_s22 = smov (!%p123_p9), [#allocation2]  }
  0x13   : > { %s147_s23 = scalar_select %p146_p10, %s395_s13, 7  ;;  %vm162_vm0 = vcmask 254976  }
  0x14   : > { %s151_s24 = scalar_select %p150_p11, %s395_s13, 4999 }
  0x15   : > { %s251_s25 = sshll.u32 %s147_s23, 1  ;;  %p297_p12 = scmp.ne.s32.totalorder %s179_s27, %s296_s17 }
  0x16   : > { %s149_s30 = scalar_lea.vmem %s466_s0, %s251_s25  ;;  %s152_s5 = scalar_lea.vmem %s467_s1, %s151_s24 }
  0x17   : > { %v153_v0 = vld [vmem:[%s149_s30] sm:$0x3]  ;;  %p298_p13 = pnand %p297_p12, %p412_p5  ;;  %s300_s23 = sshll.u32 %s358_s22, 4  ;;  %s301_s23 = int_to_ptr.vmem [resolvable:$false] %s300_s23 }
  0x18   : > { %v252_v1 = vld [vmem:[%s152_s5] ss:$0 sm:$0xff]  ;;  %s302_s24 = scalar_lea.vmem %s301_s23, 64  ;;  %p303_p1 = scmp.lt.s32.totalorder %s179_s27, %s301_s23 }
  0x19   : > { %v161_v2 = vadd.f32 %v252_v1, %v153_v0  ;;  %p299_p0 = pneg %p298_p13  ;;  %p304_p2 = scmp.lt.s32.totalorder %s302_s24, %s296_s17 }
  0x1b   : > { %163 = vst.msk [vmem:[%s145_s26] sm:$0x3] %vm162_vm0, %v161_v2  ;;  %p305_p3 = por %p304_p2, %p303_p1 }
  0x1d   : > { %p306_p4 = pnand %p305_p3, %p299_p0 }
  0x1f   : > { %309 = shalt.err (!%p306_p4)
}
  0x20   : > { %s310_s13 = scalar_lea.hbm %s176_s14, 32  ;;  %s314_s26 = scalar_lea.hbm %s468_s2, 256 }
  0x21   : > { %p311_p7 = scmp.ne.s32.totalorder %s176_s14, %s310_s13  ;;  %p315_p10 = scmp.lt.s32.totalorder %s176_s14, %s468_s2 }
  0x22   : > { %p316_p11 = scmp.lt.s32.totalorder %s314_s26, %s310_s13 }
  0x23   : > { %p312_p8 = pnand %p311_p7, %p412_p5 }
  0x24   : > { %p317_p12 = por %p316_p11, %p315_p10 }
  0x25   : > { %p313_p9 = pneg %p312_p8 }
  0x27   : > { %p318_p13 = pnand %p317_p12, %p313_p9 }
  0x29   : > { %321 = shalt.err (!%p318_p13)
}
  0x2a   : > { %257 = dma.vmem_to_hbm [thread:$0]  (%p412_p5), %s179_s27, 32, %s176_s14, %s165_s16  }
  0x2b PF: > { %p263_p0 = scmp.ge.s32.totalorder %s356_s12, 2  ;;  %s190_s30 = sand.u32 1, %s344_s9  }
  0x2c   : > { %s191_s3 = scalar_lea.sflag [#allocation3], %s190_s30 }
  0x2d   : > { %p260_p1 = pnand %p263_p0, %p416_p6 }
  0x2f   : > { %p261_p2 = pneg %p260_p1 }
  0x31   : > { %339 = dma.done.wait (%p261_p2), %s191_s3, 32  }
  0x32   : > { %341 = vsyncadd (%p261_p2), %s191_s3, 4294967264  ;;  %p12_p3 = scmp.ge.s32.totalorder %s399_s15, 10   ;;  %s471_s9 = smov %s348_s10 }
  0x33   : > { %s472_s10 = smov %s352_s11  ;;  %s473_s11 = smov %s410_s18 }
  0x34   : > { %s474_s12 = smov %s399_s15  ;;  %14 = sbr.rel (!%p12_p3) target bundleno = 3 (0x3), region = 66 }
  0x39   :  { %196 = vsyncpa [#allocation3], 1 }
  0x3a   :  { %198 = vsyncpa [#allocation3 + $0x1], 1 }

</bundles_post_ra>
